<compile_context>
chip_gen: v6e
topology: v6e:2x2x1
jax: 0.10.0
libtpu: 0.0.40
codegen_flags: <defaults>
</compile_context>

<pallas_src>
from collections import namedtuple

import numpy as np

import jax
import jax.numpy as jnp
from jax.experimental import pallas as pl
from jax.experimental.pallas import tpu as pltpu

# MXU operand dtype (accumulate / SiLU / outputs stay f32 everywhere).
MXU_DTYPE = jnp.bfloat16
# Sublane packing of MXU_DTYPE => row alignment of stage blocks in the slab.
_ROW_ALIGN = 8 * (4 // jnp.dtype(MXU_DTYPE).itemsize)


# ----------------------------------------------------------------------------
# Pixel packing: pixels in the LANE dim, ordered so that every stride-2
# subsample is a leading-lane slice inside the kernel.
# Column order (slow -> fast): (h_bit0, w_bit0, h_bit1, w_bit1, ..., n, h_hi, w_hi)
# => the stride-2^k subgrid is exactly the first N*H*W/4^k columns.
# Pure reshape/transpose, fuses under jit.
# ----------------------------------------------------------------------------
def _pack_pixels(x_nhwc, n_levels):
    """(N, H, W, C) -> (C, N*H*W) in subgrid-prefix column order."""
    n, h, w, c = x_nhwc.shape
    L = n_levels - 1
    assert h % (1 << L) == 0 and w % (1 << L) == 0
    x = x_nhwc.reshape((n, h >> L) + (2,) * L + (w >> L,) + (2,) * L + (c,))
    h_axes = list(range(1, 2 + L))           # [h_hi, h_bit_{L-1}, ..., h_bit_0]
    w_axes = list(range(2 + L, 3 + 2 * L))   # [w_hi, w_bit_{L-1}, ..., w_bit_0]
    perm = []
    for j in range(L):                       # least-significant bit pair first
        perm += [h_axes[L - j], w_axes[L - j]]
    perm += [0, h_axes[0], w_axes[0], 2 * L + 3]
    x = jnp.transpose(x, perm)
    return x.reshape(n * h * w, c).T         # (C, P)


def _unpack_pixels(y_cp, n, hk, wk, levels_left):
    """(Cout, P) in packed column order -> (N, Hk, Wk, Cout) raster order."""
    cout = y_cp.shape[0]
    L = levels_left
    y = y_cp.T.reshape((2, 2) * L + (n, hk >> L, wk >> L, cout))
    perm = [2 * L, 2 * L + 1]                          # n, h_hi
    perm += [2 * (L - 1 - j) for j in range(L)]        # h_bit_{L-1} ... h_bit_0
    perm += [2 * L + 2]                                # w_hi
    perm += [2 * (L - 1 - j) + 1 for j in range(L)]    # w_bit_{L-1} ... w_bit_0
    perm += [2 * L + 3]                                # c
    return jnp.transpose(y, perm).reshape(n, hk, wk, cout)


# ----------------------------------------------------------------------------
# Fused kernel: the whole graph in 4 stacked matmuls, 2 input refs, 1 output.
# Activations are (rows, P) with P (pixels) in lanes; every stage is
# (M, K) @ (K, P) with f32 accumulation; the last activation row is a constant
# ones row so biases live in the last weight column (folded into the MXU).
# ----------------------------------------------------------------------------
_Stage = namedtuple(
    "_Stage", "row_off m k p_in det_lane_offs has_bb c_bb p_next")


def _make_fused_head_kernel(stages, no_rows):
    def kernel(x_ref, w_ref, o_ref):
        cur = x_ref[...]                                   # (C0+1, P0) bf16
        for st in stages:
            w = w_ref[st.row_off:st.row_off + st.m, :st.k]  # (M, K) static slice
            acc = jnp.dot(w, cur, preferred_element_type=jnp.float32)  # (M, P)
            r = 0
            for lane_off in st.det_lane_offs:               # Detect rows -> slab
                o_ref[:, lane_off:lane_off + st.p_in] = (
                    acc[r:r + no_rows, :].astype(o_ref.dtype))
                r += no_rows
            if st.has_bb:
                # backbone rows + the ones row; stride-2 == leading-lane slice
                z = acc[r:r + st.c_bb + 1, :st.p_next]      # (C+1, Pn) f32
                keep = jax.lax.broadcasted_iota(jnp.int32, z.shape, 0) < st.c_bb
                z = jnp.where(keep, z * jax.nn.sigmoid(z), z)   # SiLU, skip ones row
                cur = z.astype(x_ref.dtype)
    return kernel


# ----------------------------------------------------------------------------
# Head: parameters + the fused, jitted forward.
# ----------------------------------------------------------------------------
class Head:
    """Backbone (sequential f=-1 stride-2 1x1 conv + SiLU layers) + Detect
    (f=connect, training-mode forward), lowered to ONE grid-less pallas_call
    with a single packed weight slab and a single packed output slab."""

    def __init__(self, backbone_ws, backbone_bs, connect, nc, anchors,
                 detect_ws, detect_bs, input_shape):
        self.nc = nc
        self.no = nc + 5
        self.na = len(anchors[0]) // 2
        self.connect = list(connect)
        self.nl = len(self.connect)
        no_rows = self.na * self.no

        n, h, w, _ = input_shape
        n_bb = len(backbone_ws)
        chans = [backbone_ws[0].shape[1]] + [wt.shape[0] for wt in backbone_ws]
        h0, w0 = h // 2, w // 2                 # grid after the 1st stride-2 layer
        assert h0 % (1 << (n_bb - 1)) == 0 and w0 % (1 << (n_bb - 1)) == 0
        self._n = n
        self._n_bb = n_bb
        self._level_hw = [(h0 >> li, w0 >> li) for li in range(n_bb)]
        level_cols = [n * lh * lw for lh, lw in self._level_hw]

        # output slab lane offsets, in connect order (biggest level first here)
        out_offsets, off = [], 0
        for j in self.connect:
            out_offsets.append(off)
            off += level_cols[j]
        self._out_offsets = out_offsets
        total_cols = off

        # ---- pack all stage weights into ONE slab (host-side, once) --------
        # Stage s consumes feat_{s-1} (or x for s=0) and holds, row-wise:
        #   [W_det|b_det] for every connect entry == s-1,
        #   [W_bb_s|b_bb_s]  (if s < n_bb),
        #   [0..0,1]         (ones-row generator, if s < n_bb).
        kmax = max(chans) + 1
        blocks, stages, row_off = [], [], 0
        for s in range(n_bb + 1):
            det_idx = ([oi for oi, j in enumerate(self.connect) if j == s - 1]
                       if s >= 1 else [])
            has_bb = s < n_bb
            if not det_idx and not has_bb:
                continue
            k = chans[s] + 1
            rows = []
            for oi in det_idx:
                wd = np.asarray(detect_ws[oi], np.float32)
                bd = np.asarray(detect_bs[oi], np.float32).reshape(-1, 1)
                rows.append(np.concatenate([wd, bd], axis=1))
            if has_bb:
                wb = np.asarray(backbone_ws[s], np.float32)
                bb = np.asarray(backbone_bs[s], np.float32).reshape(-1, 1)
                rows.append(np.concatenate([wb, bb], axis=1))
                ones_row = np.zeros((1, k), np.float32)
                ones_row[0, -1] = 1.0
                rows.append(ones_row)
            blk = np.concatenate(rows, axis=0)
            m = blk.shape[0]
            stages.append(_Stage(
                row_off=row_off, m=m, k=k,
                p_in=level_cols[s - 1] if s >= 1 else level_cols[0],
                det_lane_offs=tuple(out_offsets[oi] for oi in det_idx),
                has_bb=has_bb,
                c_bb=chans[s + 1] if has_bb else 0,
                p_next=level_cols[s] if has_bb else 0))
            m_pad = -(-m // _ROW_ALIGN) * _ROW_ALIGN        # align stage offsets
            blk_pad = np.zeros((m_pad, kmax), np.float32)
            blk_pad[:m, :k] = blk
            blocks.append(blk_pad)
            row_off += m_pad
        self._w_packed = jnp.asarray(np.concatenate(blocks, axis=0), MXU_DTYPE)

        kernel = _make_fused_head_kernel(tuple(stages), no_rows)
        self._pallas_head = pl.pallas_call(
            kernel,
            out_shape=jax.ShapeDtypeStruct((no_rows, total_cols), jnp.float32),
            in_specs=[pl.BlockSpec(memory_space=pltpu.MemorySpace.VMEM)] * 2,
            out_specs=pl.BlockSpec(memory_space=pltpu.MemorySpace.VMEM),
        )
        self._forward = jax.jit(self._forward_impl)

    def _forward_impl(self, x_nhwc, w_packed):
        # First backbone layer's stride-2 subsample + lane packing + ones row;
        # fused by XLA under jit into a single pass over the (tiny) input.
        x0 = x_nhwc[:, ::2, ::2, :]
        xt = _pack_pixels(x0, self._n_bb)                       # (C0, P0)
        ones = jnp.ones((1, xt.shape[1]), xt.dtype)
        x_aug = jnp.concatenate([xt, ones], axis=0).astype(MXU_DTYPE)

        raw = self._pallas_head(x_aug, w_packed)                # (na*no, ΣP) f32

        outs = []
        for oi, j in enumerate(self.connect):
            lh, lw = self._level_hw[j]
            cols = self._n * lh * lw
            off = self._out_offsets[oi]
            y = _unpack_pixels(raw[:, off:off + cols], self._n, lh, lw,
                               levels_left=self._n_bb - 1 - j)  # (N, H, W, na*no)
            y = y.reshape(self._n, lh, lw, self.na, self.no)
            # == torch view(bs, na, no, ny, nx).permute(0, 1, 3, 4, 2)
            outs.append(jnp.transpose(y, (0, 3, 1, 2, 4)))
        return outs

    def __call__(self, x_nhwc):
        return self._forward(x_nhwc, self._w_packed)


# ----------------------------------------------------------------------------
# Pure-JAX (non-Pallas) reference of Head._forward_once, mirroring the kernel's
# bf16 MXU operands / f32 accumulation, used only for validation in __main__.
# ----------------------------------------------------------------------------
def reference_forward(x_nhwc, bb_ws, bb_bs, det_ws, det_bs, connect, na, no):
    feats = []
    cur = x_nhwc
    for w, b in zip(bb_ws, bb_bs):
        cur = cur[:, ::2, ::2, :]                               # stride-2 1x1 conv
        z = jnp.einsum("nhwc,oc->nhwo", cur.astype(MXU_DTYPE), w.astype(MXU_DTYPE),
                       preferred_element_type=jnp.float32)
        z = z + b.astype(MXU_DTYPE).astype(jnp.float32)
        cur = z * jax.nn.sigmoid(z)                             # SiLU (f32)
        feats.append(cur)
    outs = []
    for i, j in enumerate(connect):
        y = jnp.einsum("nhwc,oc->nhwo", feats[j].astype(MXU_DTYPE),
                       det_ws[i].astype(MXU_DTYPE),
                       preferred_element_type=jnp.float32)
        y = y + det_bs[i].astype(MXU_DTYPE).astype(jnp.float32)
        n, h, w_, _ = y.shape
        y = y.reshape(n, h, w_, na, no)
        outs.append(jnp.transpose(y, (0, 3, 1, 2, 4)))
    return outs


# ----------------------------------------------------------------------------
if __name__ == "__main__":
    key = jax.random.PRNGKey(0)

    # dataset.yaml surrogate
    nc = 3
    anchors = [[10, 13, 16, 30, 33, 23],
               [30, 61, 62, 45, 59, 119],
               [116, 90, 156, 198, 373, 326]]
    na = len(anchors[0]) // 2
    no = nc + 5

    # backbone: 3 sequential stride-2 conv layers (f=-1), channels 4->8->16->32
    chans = [4, 8, 16, 32]
    connect = [0, 1, 2]
    ch_in = [chans[j + 1] for j in connect]

    keys = jax.random.split(key, 16)
    ki = iter(range(16))

    bb_ws, bb_bs = [], []
    for li in range(3):
        cin, cout = chans[li], chans[li + 1]
        bb_ws.append(0.1 * jax.random.normal(keys[next(ki)], (cout, cin), jnp.float32))
        bb_bs.append(0.01 * jax.random.normal(keys[next(ki)], (cout,), jnp.float32))

    det_ws, det_bs = [], []
    for c in ch_in:
        det_ws.append(0.1 * jax.random.normal(keys[next(ki)], (na * no, c), jnp.float32))
        det_bs.append(0.01 * jax.random.normal(keys[next(ki)], (na * no,), jnp.float32))

    # input: NCHW like PyTorch -> NHWC for the TPU kernel
    x_nchw = jax.random.normal(keys[next(ki)], (2, 4, 16, 16), jnp.float32)
    x_nhwc = jnp.transpose(x_nchw, (0, 2, 3, 1))

    head = Head(bb_ws, bb_bs, connect, nc, anchors, det_ws, det_bs,
                input_shape=x_nhwc.shape)

    outs = head(x_nhwc)
    outs = jax.block_until_ready(outs)

    expected = [(2, na, 8, 8, no), (2, na, 4, 4, no), (2, na, 2, 2, no)]
    assert [tuple(o.shape) for o in outs] == expected, [o.shape for o in outs]
    assert all(bool(jnp.all(jnp.isfinite(o))) for o in outs)

    # numerical check against a pure-JAX reference of the same forward pass
    refs = reference_forward(x_nhwc, bb_ws, bb_bs, det_ws, det_bs, connect, na, no)
    for o, r in zip(outs, refs):
        assert jnp.allclose(o, r, rtol=1e-2, atol=1e-3), \
            ("max_abs_diff", float(jnp.max(jnp.abs(o - r))))

    print("KERNEL_OK")
</pallas_src>

<mosaic_0001>
module attributes {stable_mosaic.version = 11 : i64} {
  func.func @kernel(%arg0: memref<5x128xbf16, #tpu.memory_space<vmem>>, %arg1: memref<160x33xbf16, #tpu.memory_space<vmem>>, %arg2: memref<24x168xf32, #tpu.memory_space<vmem>>) attributes {dimension_semantics = [], scalar_prefetch = 0 : i64, scratch_operands = 0 : i64, tpu.core_type = #tpu.core_type<tc>} {
    %c0 = arith.constant 0 : index
    %c0_0 = arith.constant 0 : index
    %0 = vector.load %arg0[%c0, %c0_0] : memref<5x128xbf16, #tpu.memory_space<vmem>>, vector<5x128xbf16>
    %c0_1 = arith.constant 0 : index
    %c0_2 = arith.constant 0 : index
    %1 = vector.load %arg1[%c0_1, %c0_2] : memref<160x33xbf16, #tpu.memory_space<vmem>>, vector<9x5xbf16>
    %cst = arith.constant dense<0.000000e+00> : vector<9x128xf32>
    %2 = tpu.matmul %1, %0, %cst {dimension_numbers = #tpu.dot_dimension_numbers<[1], [0], [0], [1], [0, 0, 1, 1], [], []>} : vector<9x5xbf16>, vector<5x128xbf16>, vector<9x128xf32> -> vector<9x128xf32>
    %3 = tpu.iota {dimensions = array<i32: 0>} : vector<9x128xi32>
    %c8_i32 = arith.constant 8 : i32
    %4 = vector.broadcast %c8_i32 : i32 to vector<9x128xi32>
    %5 = arith.cmpi slt, %3, %4 : vector<9x128xi32>
    %6 = arith.negf %2 : vector<9x128xf32>
    %7 = math.exp %6 : vector<9x128xf32>
    %cst_3 = arith.constant 1.000000e+00 : f32
    %8 = vector.broadcast %cst_3 : f32 to vector<9x128xf32>
    %9 = arith.addf %8, %7 : vector<9x128xf32>
    %10 = arith.divf %8, %9 : vector<9x128xf32>
    %11 = arith.mulf %2, %10 : vector<9x128xf32>
    %12 = arith.select %5, %11, %2 : vector<9x128xi1>, vector<9x128xf32>
    %13 = arith.truncf %12 : vector<9x128xf32> to vector<9x128xbf16>
    %c16 = arith.constant 16 : index
    %c0_4 = arith.constant 0 : index
    %14 = vector.load %arg1[%c16, %c0_4] : memref<160x33xbf16, #tpu.memory_space<vmem>>, vector<41x9xbf16>
    %cst_5 = arith.constant dense<0.000000e+00> : vector<41x128xf32>
    %15 = tpu.matmul %14, %13, %cst_5 {dimension_numbers = #tpu.dot_dimension_numbers<[1], [0], [0], [1], [0, 0, 1, 1], [], []>} : vector<41x9xbf16>, vector<9x128xbf16>, vector<41x128xf32> -> vector<41x128xf32>
    %16 = vector.extract_strided_slice %15 {offsets = [0, 0], sizes = [24, 128], strides = [1, 1]} : vector<41x128xf32> to vector<24x128xf32>
    %c0_6 = arith.constant 0 : index
    %c0_7 = arith.constant 0 : index
    %17 = vector.load %arg2[%c0_6, %c0_7] : memref<24x168xf32, #tpu.memory_space<vmem>>, vector<24x128xf32>
    tpu.vector_store %arg2[%c0_6, %c0_7], %16 {strides = array<i32>} : memref<24x168xf32, #tpu.memory_space<vmem>>, vector<24x128xf32>,
    %18 = vector.extract_strided_slice %15 {offsets = [24, 0], sizes = [17, 32], strides = [1, 1]} : vector<41x128xf32> to vector<17x32xf32>
    %19 = tpu.iota {dimensions = array<i32: 0>} : vector<17x32xi32>
    %c16_i32 = arith.constant 16 : i32
    %20 = vector.broadcast %c16_i32 : i32 to vector<17x32xi32>
    %21 = arith.cmpi slt, %19, %20 : vector<17x32xi32>
    %22 = arith.negf %18 : vector<17x32xf32>
    %23 = math.exp %22 : vector<17x32xf32>
    %cst_8 = arith.constant 1.000000e+00 : f32
    %24 = vector.broadcast %cst_8 : f32 to vector<17x32xf32>
    %25 = arith.addf %24, %23 : vector<17x32xf32>
    %26 = arith.divf %24, %25 : vector<17x32xf32>
    %27 = arith.mulf %18, %26 : vector<17x32xf32>
    %28 = arith.select %21, %27, %18 : vector<17x32xi1>, vector<17x32xf32>
    %29 = arith.truncf %28 : vector<17x32xf32> to vector<17x32xbf16>
    %c64 = arith.constant 64 : index
    %c0_9 = arith.constant 0 : index
    %30 = vector.load %arg1[%c64, %c0_9] : memref<160x33xbf16, #tpu.memory_space<vmem>>, vector<57x17xbf16>
    %cst_10 = arith.constant dense<0.000000e+00> : vector<57x32xf32>
    %31 = tpu.matmul %30, %29, %cst_10 {dimension_numbers = #tpu.dot_dimension_numbers<[1], [0], [0], [1], [0, 0, 1, 1], [], []>} : vector<57x17xbf16>, vector<17x32xbf16>, vector<57x32xf32> -> vector<57x32xf32>
    %32 = vector.extract_strided_slice %31 {offsets = [0, 0], sizes = [24, 32], strides = [1, 1]} : vector<57x32xf32> to vector<24x32xf32>
    %c0_11 = arith.constant 0 : index
    %c128 = arith.constant 128 : index
    %33 = vector.load %arg2[%c0_11, %c128] : memref<24x168xf32, #tpu.memory_space<vmem>>, vector<24x32xf32>
    tpu.vector_store %arg2[%c0_11, %c128], %32 {strides = array<i32>} : memref<24x168xf32, #tpu.memory_space<vmem>>, vector<24x32xf32>,
    %34 = vector.extract_strided_slice %31 {offsets = [24, 0], sizes = [33, 8], strides = [1, 1]} : vector<57x32xf32> to vector<33x8xf32>
    %35 = tpu.iota {dimensions = array<i32: 0>} : vector<33x8xi32>
    %c32_i32 = arith.constant 32 : i32
    %36 = vector.broadcast %c32_i32 : i32 to vector<33x8xi32>
    %37 = arith.cmpi slt, %35, %36 : vector<33x8xi32>
    %38 = arith.negf %34 : vector<33x8xf32>
    %39 = math.exp %38 : vector<33x8xf32>
    %cst_12 = arith.constant 1.000000e+00 : f32
    %40 = vector.broadcast %cst_12 : f32 to vector<33x8xf32>
    %41 = arith.addf %40, %39 : vector<33x8xf32>
    %42 = arith.divf %40, %41 : vector<33x8xf32>
    %43 = arith.mulf %34, %42 : vector<33x8xf32>
    %44 = arith.select %37, %43, %34 : vector<33x8xi1>, vector<33x8xf32>
    %45 = arith.truncf %44 : vector<33x8xf32> to vector<33x8xbf16>
    %c128_13 = arith.constant 128 : index
    %c0_14 = arith.constant 0 : index
    %46 = vector.load %arg1[%c128_13, %c0_14] : memref<160x33xbf16, #tpu.memory_space<vmem>>, vector<24x33xbf16>
    %cst_15 = arith.constant dense<0.000000e+00> : vector<24x8xf32>
    %47 = tpu.matmul %46, %45, %cst_15 {dimension_numbers = #tpu.dot_dimension_numbers<[1], [0], [0], [1], [0, 0, 1, 1], [], []>} : vector<24x33xbf16>, vector<33x8xbf16>, vector<24x8xf32> -> vector<24x8xf32>
    %c0_16 = arith.constant 0 : index
    %c160 = arith.constant 160 : index
    %48 = vector.load %arg2[%c0_16, %c160] : memref<24x168xf32, #tpu.memory_space<vmem>>, vector<24x8xf32>
    tpu.vector_store %arg2[%c0_16, %c160], %47 {strides = array<i32>} : memref<24x168xf32, #tpu.memory_space<vmem>>, vector<24x8xf32>,
    return
  }
}

</mosaic_0001>

<bundles_post_ra>
// kernel: _forward_impl.1
= control target key start
LH: loop header
LB: loop body
LE: loop exit
PB: predicated region body
PF: predicated region fallthrough
CT: control target
= control target key end

     0   :  { %vm24_vm0 = vcmask 1041408   ;;  %vm25_vm1 = vcmask 1042432   ;;  %v609_v0 = vmov 0.0   ;;  %v610_v2 = vmov 65535   ;;  %s613_s13 = smov 32   ;;  %s699_s0 = inlined_call_operand.vmem [shape: bf16[5,128], index: 0, kind: input, shape index: {}]   ;;  %s700_s1 = inlined_call_operand.vmem [shape: bf16[160,33], index: 1, kind: input, shape index: {}]   ;;  %s701_s2 = inlined_call_operand.vmem [shape: f32[24,168], index: 2, kind: output, shape index: {}]  }
   0x1   :  { %524 = vmatprep.subr.bf16.mxu0 %v609_v0  ;;  %v12_v1 = vld [vmem:[%s699_s0] sm:$0x7]  ;;  %v26_v3 = vsel %vm24_vm0, 4294967295, %v610_v2  ;;  %530 = vmatprep.subr.bf16.mxu1 %v609_v0  ;;  %vm611_vm2 = vmmov 0   ;;  %vm20_vm3 = vcmask 39936   ;;  %vm125_vm4 = vcmask 1043456  }
   0x2   :  { %v27_v4 = vsel %vm25_vm1, %v26_v3, 0  ;;  %526 = vmatprep.mubr.msk.bf16.mxu0 %vm611_vm2, %v609_v0  ;;  %v571_v5 = vld [vmem:[%s700_s1] sm:$0x1f]   ;;  %532 = vmatprep.mubr.msk.bf16.mxu1 %vm611_vm2, %v609_v0  ;;  %vm126_vm5 = vcmask 1044480   ;;  %v127_v14 = vsel %vm125_vm4, 4294967295, %v610_v2  ;;  %v572_v20 = vld [vmem:[%s700_s1 + $0x8] sm:$0xff]  }
   0x3   :  { %v29_v6 = vand.u32 %v27_v4, %v12_v1  ;;  %v128_v17 = vsel %vm126_vm5, %v127_v14, 0  ;;  %vm115_vm6 = vcmask 72704   ;;  %v573_v21 = vld [vmem:[%s700_s1 + $0x10] sm:$0xff]   ;;  %v574_v22 = vld [vmem:[%s700_s1 + $0x18] sm:$0x1f]   ;;  %v575_v23 = vld [vmem:[%s700_s1 + $0x20] sm:$0xff]  }
   0x4   :  { %vm250_vm7 = vcmask 138240   ;;  %vm263_vm8 = vcmask 1040384   ;;  %v612_v37 = vmov 0   ;;  %v576_v51 = vld [vmem:[%s700_s1 + $0x28] sm:$0xff]   ;;  %v577_v52 = vld [vmem:[%s700_s1 + $0x30] sm:$0xff]   ;;  %v579_v54 = vld [vmem:[%s700_s1 + $0x40] sm:$0xff]  }
   0x5   :  { %525 = vmatpush3.bf16.msra.mxu0 %v29_v6  ;;  %v265_v38 = vsel %vm263_vm8, 65535, %v612_v37  ;;  %v578_v53 = vld [vmem:[%s700_s1 + $0x38] sm:$0x1f]   ;;  %vm399_vm9 = vcmask 269312   ;;  %vm334_vm10 = vcmask 261120   ;;  %vm469_vm11 = vcmask 326912  }
   0x8   :  { %527 = vmatmul.mubr.msk.bf16.vlgmr.msra.gmra.mxu0 %vm20_vm3, %v571_v5 }
   0x9   :  { %548 = vmatprep.mubr.msk.bf16.mxu0 %vm250_vm7, %v575_v23  ;;  %v580_v23 = vld [vmem:[%s700_s1 + $0x48] ss:$0 sps:$4 sm:$0xff]  }
  0xc8   :  { %v65_v7 = vpop.f32.mrf.mxu0 }
  0xc9   :  { %v479_v8 = vmul.f32 -1.442695, %v65_v7 }
  0xca   :  { %v528_v9 = vpop.f32.mrf.mxu0 }
  0xcb   :  { %581 = vpow2.f32 %v479_v8 }
  0xcc   :  { %v68_v10 = vpop.f32.mrf.mxu0 }
  0xce   :  { %v529_v11 = vpop.f32.mrf.mxu0 }
  0xd8   :  { %v582_v12 = vpop.eup %581 }
  0xd9   :  { %v83_v13 = vadd.f32 1.0, %v582_v12 }
  0xdb   :  { %583 = vrcp.f32 %v83_v13 }
  0xe8   :  { %v584_v15 = vpop.eup %583 }
  0xe9   :  { %v89_v16 = vmul.f32 %v584_v15, %v65_v7 }
  0xeb   :  { %v93_v18 = vpack.c.bf16 %v68_v10, %v89_v16 }
  0xed   :  { %v130_v19 = vand.u32 %v128_v17, %v93_v18 }
  0xef   :  { %531 = vmatpush3.bf16.msra.mxu1 %v130_v19 }
  0xf2   :  { %533 = vmatmul.mubr.msk.bf16.vlgmr.msra.gmra.mxu1 %vm115_vm6, %v572_v20 }
  0xf3   :  { %536 = vmatprep.mubr.msk.bf16.mxu1 %vm611_vm2, %v609_v0 }
  0xfa   :  { %537 = vmatmul.mubr.msk.bf16.gmra.mxu1 %vm115_vm6, %v573_v21 }
  0xfb   :  { %540 = vmatprep.mubr.msk.bf16.mxu1 %vm611_vm2, %v609_v0 }
 0x102   :  { %541 = vmatmul.mubr.msk.bf16.gmra.mxu1 %vm115_vm6, %v574_v22 }
 0x1b2   :  { %v166_v24 = vpop.f32.mrf.mxu1 }
 0x1b3   :  { %189 = vst [vmem:[%s701_s2] sm:$0xff] %v166_v24 }
 0x1b4   :  { %v534_v25 = vpop.f32.mrf.mxu1 }
 0x1b6   :  { %v169_v26 = vpop.f32.mrf.mxu1 }
 0x1b7   :  { %190 = vst [vmem:[%s701_s2 + $0x10] sm:$0xff] %v169_v26 }
 0x1b8   :  { %v535_v27 = vpop.f32.mrf.mxu1 }
 0x1ba   :  { %v174_v28 = vpop.f32.mrf.mxu1 }
 0x1bb   :  { %191 = vst [vmem:[%s701_s2 + $0x20] sm:$0xff] %v174_v28 }
 0x1bc   :  { %v538_v29 = vpop.f32.mrf.mxu1 }
 0x1be   :  { %v177_v30 = vpop.f32.mrf.mxu1 }
 0x1bf   :  { %v487_v31 = vmul.f32 -1.442695, %v177_v30 }
 0x1c0   :  { %v539_v32 = vpop.f32.mrf.mxu1 }
 0x1c1   :  { %585 = vpow2.f32 %v487_v31 }
 0x1c2   :  { %v182_v33 = vpop.f32.mrf.mxu1 }
 0x1c3   :  { %v488_v34 = vmul.f32 -1.442695, %v182_v33 }
 0x1c4   :  { %v542_v35 = vpop.f32.mrf.mxu1 }
 0x1c5   :  { %587 = vpow2.f32 %v488_v34 }
 0x1c6   :  { %v185_v36 = vpop.f32.mrf.mxu1 }
 0x1c7   :  { %v221_v39 = vpack.c.bf16 %v185_v36, %v185_v36 }
 0x1c8   :  { %v543_v40 = vpop.f32.mrf.mxu1 }
 0x1c9   :  { %v267_v41 = vand.u32 %v265_v38, %v221_v39 }
 0x1cb   :  { %544 = vmatprep.subr.bf16.mxu0 %v267_v41 }
 0x1cc   :  { %545 = vmatpush3.bf16.msra.mxu0 %v267_v41 }
 0x1ce   :  { %v586_v42 = vpop.eup %585 }
 0x1cf   :  { %v205_v43 = vadd.f32 1.0, %v586_v42 }
 0x1d1   :  { %589 = vrcp.f32 %v205_v43 }
 0x1d2   :  { %v588_v44 = vpop.eup %587 }
 0x1d3   :  { %v206_v45 = vadd.f32 1.0, %v588_v44 }
 0x1d5   :  { %591 = vrcp.f32 %v206_v45 }
 0x1de   :  { %v590_v46 = vpop.eup %589 }
 0x1df   :  { %v214_v48 = vmul.f32 %v590_v46, %v177_v30 }
 0x1e2   :  { %v592_v47 = vpop.eup %591 }
 0x1e3   :  { %v215_v49 = vmul.f32 %v592_v47, %v182_v33 }
 0x1e5   :  { %v220_v50 = vpack.c.bf16 %v215_v49, %v214_v48 }
 0x1e7   :  { %546 = vmatprep.subr.bf16.mxu0 %v220_v50 }
 0x1e8   :  { %547 = vmatpush3.bf16.msra.mxu0 %v220_v50 }
 0x1eb   :  { %549 = vmatmul.mubr.msk.bf16.vlgmr.msra.gmra.mxu0 %vm250_vm7, %v576_v51 }
 0x1ec   :  { %552 = vmatprep.mubr.msk.bf16.mxu0 %vm250_vm7, %v577_v52 }
 0x1f3   :  { %553 = vmatmul.mubr.msk.bf16.gmra.mxu0 %vm250_vm7, %v578_v53 }
 0x1f4   :  { %562 = vmatprep.mubr.msk.bf16.mxu0 %vm399_vm9, %v579_v54 }
 0x2ab   :  { %v550_v55 = vpop.f32.mrf.mxu0 }
 0x2ac   :  { %337 = vst.msk [vmem:[%s701_s2 + $0x28] sm:$0xff] %vm334_vm10, %v550_v55 }
 0x2ad   :  { %v303_v56 = vpop.f32.mrf.mxu0 }
 0x2ae   :  { %335 = vst.msk [vmem:[%s701_s2 + $0x8] sm:$0xff] %vm334_vm10, %v303_v56 }
 0x2af   :  { %v551_v57 = vpop.f32.mrf.mxu0 }
 0x2b0   :  { %v498_v59 = vmul.f32 -1.442695, %v551_v57 }
 0x2b1   :  { %v306_v58 = vpop.f32.mrf.mxu0 }
 0x2b2   :  { %336 = vst.msk [vmem:[%s701_s2 + $0x18] sm:$0xff] %vm334_vm10, %v306_v58 }
 0x2b3   :  { %v554_v60 = vpop.f32.mrf.mxu0 }
 0x2b4   :  { %v501_v61 = vmul.f32 -1.442695, %v554_v60 }
 0x2b5   :  { %v319_v62 = vpop.f32.mrf.mxu0 }
 0x2b6   :  { %593 = vpow2.f32 %v501_v61  ;;  %v499_v63 = vmul.f32 -1.442695, %v319_v62 }
 0x2b7   :  { %595 = vpow2.f32 %v498_v59  ;;  %v555_v0 = vpop.f32.mrf.mxu0 }
 0x2b8   :  { %597 = vpow2.f32 %v499_v63  ;;  %v387_v1 = vpack.c.bf16 %v555_v0, %v555_v0 }
 0x2b9   :  { %v322_v2 = vpop.f32.mrf.mxu0 }
 0x2ba   :  { %v407_v3 = vand.u32 %v387_v1, %v265_v38  ;;  %v500_v4 = vmul.f32 -1.442695, %v322_v2 }
 0x2bc   :  { %599 = vpow2.f32 %v500_v4  ;;  %556 = vmatprep.subr.bf16.mxu0 %v407_v3 }
 0x2bd   :  { %557 = vmatpush3.bf16.msra.mxu0 %v407_v3 }
 0x2c3   :  { %v594_v5 = vpop.eup %593 }
 0x2c4   :  { %v596_v6 = vpop.eup %595  ;;  %v363_v8 = vadd.f32 1.0, %v594_v5 }
 0x2c5   :  { %v598_v7 = vpop.eup %597  ;;  %v360_v10 = vadd.f32 1.0, %v596_v6 }
 0x2c6   :  { %v361_v9 = vadd.f32 1.0, %v598_v7  ;;  %601 = vrcp.f32 %v363_v8 }
 0x2c8   :  { %603 = vrcp.f32 %v361_v9 }
 0x2c9   :  { %v600_v11 = vpop.eup %599  ;;  %605 = vrcp.f32 %v360_v10 }
 0x2ca   :  { %v362_v12 = vadd.f32 1.0, %v600_v11 }
 0x2cc   :  { %607 = vrcp.f32 %v362_v12 }
 0x2d3   :  { %v602_v13 = vpop.eup %601 }
 0x2d4   :  { %v378_v17 = vmul.f32 %v602_v13, %v554_v60 }
 0x2d5   :  { %v604_v14 = vpop.eup %603 }
 0x2d6   :  { %v606_v15 = vpop.eup %605  ;;  %v376_v18 = vmul.f32 %v604_v14, %v319_v62 }
 0x2d7   :  { %v375_v20 = vmul.f32 %v606_v15, %v551_v57 }
 0x2d9   :  { %v608_v16 = vpop.eup %607  ;;  %v385_v22 = vpack.c.bf16 %v376_v18, %v375_v20 }
 0x2da   :  { %v377_v19 = vmul.f32 %v608_v16, %v322_v2 }
 0x2dc   :  { %v386_v21 = vpack.c.bf16 %v378_v17, %v377_v19 }
 0x2de   :  { %558 = vmatprep.subr.bf16.mxu0 %v386_v21 }
 0x2df   :  { %559 = vmatpush3.bf16.msra.mxu0 %v386_v21 }
 0x2e0   :  { %560 = vmatprep.subr.bf16.mxu0 %v385_v22 }
 0x2e3   :  { %561 = vmatpush3.bf16.msra.mxu0 %v385_v22 }
 0x2e6   :  { %563 = vmatmul.mubr.msk.bf16.vlgmr.msra.gmra.mxu0 %vm399_vm9, %v580_v23 }
 0x3a6   :  { %v564_v24 = vpop.f32.mrf.mxu0 }
 0x3a7   :  { %464 = vrot.lane.b32.xlu1 %v564_v24, %s613_s13 }
 0x3a8   :  { %v443_v25 = vpop.f32.mrf.mxu0 }
 0x3a9   :  { %460 = vrot.lane.b32.xlu0 %v443_v25, %s613_s13 }
 0x3aa   :  { %v565_v26 = vpop.f32.mrf.mxu0 }
 0x3ac   :  { %v446_v27 = vpop.f32.mrf.mxu0 }
 0x3ad   :  { %462 = vrot.lane.b32.xlu0 %v446_v27, %s613_s13 }
 0x419   :  { %v465_v28 = vpop.permute.xlu1 %464 }
 0x41a   :  { %472 = vst.msk [vmem:[%s701_s2 + $0x28] sm:$0xff] %vm469_vm11, %v465_v28 }
 0x41b   :  { %v461_v29 = vpop.permute.xlu0 %460 }
 0x41c   :  { %470 = vst.msk [vmem:[%s701_s2 + $0x8] sm:$0xff] %vm469_vm11, %v461_v29 }
 0x41f   :  { %v463_v30 = vpop.permute.xlu0 %462 }
 0x420   :  { %471 = vst.msk [vmem:[%s701_s2 + $0x18] sm:$0xff] %vm469_vm11, %v463_v30 }

</bundles_post_ra>
